<compile_context>
chip_gen: v7x
topology: tpu7x:2x2x1
jax: 0.10.0
libtpu: 0.0.40
codegen_flags: <defaults>
</compile_context>

<pallas_src>
import jax
import jax.numpy as jnp
from jax.experimental import pallas as pl
from jax.experimental.pallas import tpu as pltpu

_SQRT_HALF = 0.7071067811865476


# --------------------------------------------------------------------------- #
# Kernel bodies
# --------------------------------------------------------------------------- #
def _apply_gelu(h_f32, w2_dtype):
    # Exact (erf) GELU in f32 matches nn.GELU() default numerics.
    # bf16-weight configs: tanh-approx GELU in bf16 -> EUP slot, VALU relief
    # on v6e/v7x (documented mixed-precision deviation, per perf review).
    if w2_dtype == jnp.bfloat16:
        return jax.nn.gelu(h_f32.astype(jnp.bfloat16), approximate=True)
    h = 0.5 * h_f32 * (1.0 + jax.lax.erf(h_f32 * jnp.float32(_SQRT_HALF)))
    return h.astype(w2_dtype)


def _ff_kernel_resident(x_ref, w1_ref, b1_ref, w2_ref, b2_ref, o_ref):
    # Weights stay resident in VMEM across all row tiles (constant index_map).
    h = jnp.dot(x_ref[...], w1_ref[...], preferred_element_type=jnp.float32)
    h = h + b1_ref[...].astype(jnp.float32)
    # TODO(synk): nn.Dropout is identity in eval/inference mode; train-mode RNG
    # masking is intentionally not emulated here.
    h = _apply_gelu(h, w2_ref.dtype)
    out = jnp.dot(h, w2_ref[...], preferred_element_type=jnp.float32)
    o_ref[...] = (out + b2_ref[...].astype(jnp.float32)).astype(o_ref.dtype)


def _ff_kernel_reduce(x_ref, w1_ref, b1_ref, w2_ref, b2_ref, o_ref, acc_ref):
    # x_ref : [TM, dim]   w1_ref : [dim, TK]   b1_ref : [1, TK]
    # w2_ref: [TK, dim]   b2_ref : [1, dim]    o_ref  : [TM, dim]
    # acc_ref (scratch): [TM, dim] f32, resident across the dimx grid axis.
    k = pl.program_id(1)

    h = jnp.dot(x_ref[...], w1_ref[...], preferred_element_type=jnp.float32)
    h = h + b1_ref[...].astype(jnp.float32)
    # TODO(synk): dropout is identity at inference (see resident kernel note).
    h = _apply_gelu(h, w2_ref.dtype)
    part = jnp.dot(h, w2_ref[...], preferred_element_type=jnp.float32)

    # Fused init: first reduction step writes directly (no zero + RMW).
    @pl.when(k == 0)
    def _():
        acc_ref[...] = part

    @pl.when(k != 0)
    def _():
        acc_ref[...] += part

    @pl.when(k == pl.num_programs(1) - 1)
    def _():
        o_ref[...] = (acc_ref[...] + b2_ref[...].astype(jnp.float32)).astype(o_ref.dtype)


# --------------------------------------------------------------------------- #
# Tiling / VMEM sizing helpers (generation-aware)
# --------------------------------------------------------------------------- #
def _vmem_capacity_bytes():
    try:
        info = pltpu.get_tpu_info()
        cap = getattr(info, "vmem_capacity_bytes", None)
        if cap:
            return int(cap)
    except Exception:
        pass
    return 64 * 1024 * 1024  # conservative fallback (v7x per-TC VMEM)


def _round_up(v, m):
    return ((v + m - 1) // m) * m


def _tm_candidates(M):
    cands = []
    if 8 < M <= 1024:
        # Guarantee >= 2 row tiles so both v7x TensorCores get work.
        cands.append(min(512, _round_up(pl.cdiv(M, 2), 8)))
    for t in (512, 256, 128, 64, 32, 16, 8):
        if t <= M and t not in cands:
            cands.append(t)
    if not cands:
        cands.append(M)
    return cands


def _resident_need(tm, dim, dimx, ebytes, wbytes):
    return (2 * tm * dim * ebytes                 # x tiles (double-buffered)
            + 2 * tm * dim * ebytes               # out tiles
            + 2 * (2 * dim * dimx) * wbytes       # w1 + w2 (buffer pairs)
            + 2 * (dimx + dim) * wbytes           # biases
            + tm * dimx * 4                       # f32 hidden temporary
            + tm * dimx * wbytes)                 # hidden cast for 2nd matmul


def _reduction_need(tm, tk, dim, dimx, ebytes, wbytes):
    return (2 * tm * dim * ebytes                 # x tiles
            + 2 * tm * dim * ebytes               # out tiles
            + 2 * (2 * dim * tk) * wbytes         # w1/w2 slabs (double-buffered)
            + 2 * (tk + dim) * wbytes             # bias slabs
            + tm * dim * 4                        # f32 accumulator scratch
            + tm * tk * 4                         # f32 hidden slab
            + tm * tk * wbytes)                   # hidden cast


def _select_tiling(M, dim, dimx, ebytes, wbytes, budget, *, force_reduction=False):
    tms = _tm_candidates(M)
    if not force_reduction:
        for tm in tms:
            need = _resident_need(tm, dim, dimx, ebytes, wbytes)
            if need <= budget:
                return tm, None, need
    # Reduction over dimx: largest tk (multiple of 256 when possible, matching
    # the v6e/v7x MXU) that divides dimx and fits the VMEM budget.
    tk_cands = [t for t in (2048, 1024, 512, 256, 128) if dimx % t == 0] or [dimx]
    for tm in tms:
        for tk in tk_cands:
            need = _reduction_need(tm, tk, dim, dimx, ebytes, wbytes)
            if need <= budget:
                return tm, tk, need
    tm, tk = tms[-1], tk_cands[-1]
    return tm, tk, _reduction_need(tm, tk, dim, dimx, ebytes, wbytes)


# --------------------------------------------------------------------------- #
# Wrapper
# --------------------------------------------------------------------------- #
def forward_pallas(x, w1, b1, w2, b2, *, force_reduction=False, budget_override=None):
    """x: [B, S, dim]; w1: [dim, dimx]; b1: [dimx]; w2: [dimx, dim]; b2: [dim]."""
    B, S, dim = x.shape
    dimx = w1.shape[1]
    M = B * S
    x2d = x.reshape(M, dim)
    b1_2d = b1.reshape(1, dimx)
    b2_2d = b2.reshape(1, dim)

    ebytes = jnp.dtype(x.dtype).itemsize
    wbytes = jnp.dtype(w1.dtype).itemsize

    vmem_cap = _vmem_capacity_bytes()
    budget = int(budget_override) if budget_override else int(vmem_cap * 0.8)

    tm, tk, vmem_need = _select_tiling(
        M, dim, dimx, ebytes, wbytes, budget, force_reduction=force_reduction)

    # Never exceed ~85% of the physical VMEM (v7x: 64 MiB; v5e/v6e: 128 MiB).
    vmem_limit = int(min(max(int(vmem_need * 1.3), 32 * 1024 * 1024),
                         int(vmem_cap * 0.85)))

    num_row_tiles = pl.cdiv(M, tm)
    weight_bytes = (dim * dimx + dimx * dim + dimx + dim) * wbytes
    weight_reads = 1 if tk is None else num_row_tiles  # re-streamed only in reduce mode
    cost = pl.CostEstimate(
        flops=int(4 * M * dim * dimx),                       # two matmuls
        transcendentals=int(M * dimx),                       # erf / tanh
        bytes_accessed=int(2 * M * dim * ebytes + weight_reads * weight_bytes),
    )

    if tk is None:
        # ---- Weights-resident fast path: grid over row tiles only ----
        grid = (num_row_tiles,)
        in_specs = [
            pl.BlockSpec((tm, dim), lambda i: (i, 0)),     # x rows
            pl.BlockSpec((dim, dimx), lambda i: (0, 0)),   # w1 (resident, single DMA)
            pl.BlockSpec((1, dimx), lambda i: (0, 0)),     # b1 (resident)
            pl.BlockSpec((dimx, dim), lambda i: (0, 0)),   # w2 (resident, single DMA)
            pl.BlockSpec((1, dim), lambda i: (0, 0)),      # b2 (resident)
        ]
        out_specs = pl.BlockSpec((tm, dim), lambda i: (i, 0))
        scratch_shapes = []
        kernel = _ff_kernel_resident
        dim_sem = ("parallel",)
    else:
        # ---- Fallback: tile dimx as a trailing reduction axis ----
        grid = (num_row_tiles, dimx // tk)
        in_specs = [
            pl.BlockSpec((tm, dim), lambda i, k: (i, 0)),    # x rows
            pl.BlockSpec((dim, tk), lambda i, k: (0, k)),    # w1 slab
            pl.BlockSpec((1, tk), lambda i, k: (0, k)),      # b1 slab
            pl.BlockSpec((tk, dim), lambda i, k: (k, 0)),    # w2 slab
            pl.BlockSpec((1, dim), lambda i, k: (0, 0)),     # b2
        ]
        out_specs = pl.BlockSpec((tm, dim), lambda i, k: (i, 0))
        scratch_shapes = [pltpu.VMEM((tm, dim), jnp.float32)]
        kernel = _ff_kernel_reduce
        dim_sem = ("parallel", "arbitrary")

    out2d = pl.pallas_call(
        kernel,
        out_shape=jax.ShapeDtypeStruct((M, dim), x.dtype),
        grid_spec=pltpu.PrefetchScalarGridSpec(
            num_scalar_prefetch=0,
            grid=grid,
            in_specs=in_specs,
            out_specs=out_specs,
            scratch_shapes=scratch_shapes,
        ),
        compiler_params=pltpu.CompilerParams(
            dimension_semantics=dim_sem,
            vmem_limit_bytes=vmem_limit,
        ),
        cost_estimate=cost,
    )(x2d, w1, b1_2d, w2, b2_2d)

    return out2d.reshape(B, S, dim)


# --------------------------------------------------------------------------- #
# Reference + tests
# --------------------------------------------------------------------------- #
def _reference(x, w1, b1, w2, b2):
    h = jnp.einsum("bsd,df->bsf", x, w1) + b1
    h = 0.5 * h * (1.0 + jax.lax.erf(h * 0.7071067811865476))
    return jnp.einsum("bsf,fd->bsd", h, w2) + b2


if __name__ == "__main__":
    # ---- Small test matching the module spec (fc weight/bias = 0) ----
    B, S, dim = 2, 8, 32
    dimx = dim * 4

    key = jax.random.PRNGKey(0)
    kx, kw1, kb1 = jax.random.split(key, 3)

    x = jax.random.normal(kx, (B, S, dim), dtype=jnp.float32)

    bound1 = 1.0 / float(dim) ** 0.5
    w1 = jax.random.uniform(kw1, (dim, dimx), jnp.float32, -bound1, bound1)
    b1 = jax.random.uniform(kb1, (dimx,), jnp.float32, -bound1, bound1)

    # self.fc = nn.Linear(dimx, dim) with weight/bias filled with 0 (as in __init__)
    w2 = jnp.zeros((dimx, dim), dtype=jnp.float32)
    b2 = jnp.zeros((dim,), dtype=jnp.float32)

    out = jax.block_until_ready(forward_pallas(x, w1, b1, w2, b2))
    ref = _reference(x, w1, b1, w2, b2)
    assert out.shape == (B, S, dim)
    assert jnp.allclose(out, ref, atol=1e-5, rtol=1e-5)

    # ---- Larger aligned test: weights-resident path + M tiling (2 row tiles) ----
    B2, S2, dim2 = 4, 256, 256
    dimx2 = dim2 * 4
    k1, k2, k3, k4, k5 = jax.random.split(jax.random.PRNGKey(1), 5)
    x_l = jax.random.normal(k1, (B2, S2, dim2), dtype=jnp.float32)
    bnd = 1.0 / float(dim2) ** 0.5
    w1_l = jax.random.uniform(k2, (dim2, dimx2), jnp.float32, -bnd, bnd)
    b1_l = jax.random.uniform(k3, (dimx2,), jnp.float32, -bnd, bnd)
    w2_l = jax.random.uniform(k4, (dimx2, dim2), jnp.float32, -bnd, bnd)
    b2_l = jax.random.uniform(k5, (dim2,), jnp.float32, -bnd, bnd)

    ref_l = _reference(x_l, w1_l, b1_l, w2_l, b2_l)

    out_l = jax.block_until_ready(forward_pallas(x_l, w1_l, b1_l, w2_l, b2_l))
    assert out_l.shape == (B2, S2, dim2)
    assert jnp.allclose(out_l, ref_l, atol=1e-3, rtol=1e-4)

    # ---- Same problem, forced through the dimx-reduction (accumulator) path ----
    out_r = jax.block_until_ready(
        forward_pallas(x_l, w1_l, b1_l, w2_l, b2_l,
                       force_reduction=True, budget_override=4 * 1024 * 1024))
    assert out_r.shape == (B2, S2, dim2)
    assert jnp.allclose(out_r, ref_l, atol=1e-3, rtol=1e-4)

    print("KERNEL_OK")
</pallas_src>

<mosaic_0001>
module attributes {stable_mosaic.version = 11 : i64} {
  func.func @_ff_kernel_resident(%arg0: i32, %arg1: memref<8x32xf32, #tpu.memory_space<vmem>>, %arg2: memref<32x128xf32, #tpu.memory_space<vmem>>, %arg3: memref<1x128xf32, #tpu.memory_space<vmem>>, %arg4: memref<128x32xf32, #tpu.memory_space<vmem>>, %arg5: memref<1x32xf32, #tpu.memory_space<vmem>>, %arg6: memref<8x32xf32, #tpu.memory_space<vmem>>) attributes {dimension_semantics = [#tpu.dimension_semantics<parallel>], iteration_bounds = array<i64: 2>, scalar_prefetch = 0 : i64, scratch_operands = 0 : i64, tpu.core_type = #tpu.core_type<tc>, window_params = [{transform_indices = @transform_0, window_bounds = array<i64: 8, 32>}, {pipeline_mode = #tpu.pipeline_mode<synchronous>, transform_indices = @transform_1, window_bounds = array<i64: 32, 128>}, {pipeline_mode = #tpu.pipeline_mode<synchronous>, transform_indices = @transform_2, window_bounds = array<i64: 1, 128>}, {pipeline_mode = #tpu.pipeline_mode<synchronous>, transform_indices = @transform_3, window_bounds = array<i64: 128, 32>}, {pipeline_mode = #tpu.pipeline_mode<synchronous>, transform_indices = @transform_4, window_bounds = array<i64: 1, 32>}, {transform_indices = @transform_5, window_bounds = array<i64: 8, 32>}]} {
    %c0 = arith.constant 0 : index
    %c0_0 = arith.constant 0 : index
    %0 = vector.load %arg1[%c0, %c0_0] : memref<8x32xf32, #tpu.memory_space<vmem>>, vector<8x32xf32>
    %c0_1 = arith.constant 0 : index
    %c0_2 = arith.constant 0 : index
    %1 = vector.load %arg2[%c0_1, %c0_2] : memref<32x128xf32, #tpu.memory_space<vmem>>, vector<32x128xf32>
    %cst = arith.constant dense<0.000000e+00> : vector<8x128xf32>
    %2 = tpu.matmul %0, %1, %cst {dimension_numbers = #tpu.dot_dimension_numbers<[1], [0], [0], [1], [0, 0, 1, 1], [], []>} : vector<8x32xf32>, vector<32x128xf32>, vector<8x128xf32> -> vector<8x128xf32>
    %c0_3 = arith.constant 0 : index
    %c0_4 = arith.constant 0 : index
    %3 = vector.load %arg3[%c0_3, %c0_4] : memref<1x128xf32, #tpu.memory_space<vmem>>, vector<1x128xf32>
    %4 = vector.broadcast %3 : vector<1x128xf32> to vector<8x128xf32>
    %5 = arith.addf %2, %4 : vector<8x128xf32>
    %cst_5 = arith.constant 5.000000e-01 : f32
    %6 = vector.broadcast %cst_5 : f32 to vector<8x128xf32>
    %7 = arith.mulf %6, %5 : vector<8x128xf32>
    %cst_6 = arith.constant 0.707106769 : f32
    %8 = vector.broadcast %cst_6 : f32 to vector<8x128xf32>
    %9 = arith.mulf %5, %8 : vector<8x128xf32>
    %10 = math.erf %9 : vector<8x128xf32>
    %cst_7 = arith.constant 1.000000e+00 : f32
    %11 = vector.broadcast %cst_7 : f32 to vector<8x128xf32>
    %12 = arith.addf %11, %10 : vector<8x128xf32>
    %13 = arith.mulf %7, %12 : vector<8x128xf32>
    %c0_8 = arith.constant 0 : index
    %c0_9 = arith.constant 0 : index
    %14 = vector.load %arg4[%c0_8, %c0_9] : memref<128x32xf32, #tpu.memory_space<vmem>>, vector<128x32xf32>
    %cst_10 = arith.constant dense<0.000000e+00> : vector<8x32xf32>
    %15 = tpu.matmul %13, %14, %cst_10 {dimension_numbers = #tpu.dot_dimension_numbers<[1], [0], [0], [1], [0, 0, 1, 1], [], []>} : vector<8x128xf32>, vector<128x32xf32>, vector<8x32xf32> -> vector<8x32xf32>
    %c0_11 = arith.constant 0 : index
    %c0_12 = arith.constant 0 : index
    %16 = vector.load %arg5[%c0_11, %c0_12] : memref<1x32xf32, #tpu.memory_space<vmem>>, vector<1x32xf32>
    %17 = vector.broadcast %16 : vector<1x32xf32> to vector<8x32xf32>
    %18 = arith.addf %15, %17 : vector<8x32xf32>
    %c0_13 = arith.constant 0 : index
    %c0_14 = arith.constant 0 : index
    %19 = vector.load %arg6[%c0_13, %c0_14] : memref<8x32xf32, #tpu.memory_space<vmem>>, vector<8x32xf32>
    tpu.vector_store %arg6[%c0_13, %c0_14], %18 {strides = array<i32>} : memref<8x32xf32, #tpu.memory_space<vmem>>, vector<8x32xf32>,
    return
  }
  func.func @transform_0(%arg0: i32) -> (i32, i32) {
    %c0_i32 = arith.constant 0 : i32
    %c0_i32_0 = arith.constant 0 : i32
    return %arg0, %c0_i32 : i32, i32
  }
  func.func @transform_1(%arg0: i32) -> (i32, i32) {
    %c0_i32 = arith.constant 0 : i32
    %c0_i32_0 = arith.constant 0 : i32
    %c0_i32_1 = arith.constant 0 : i32
    return %c0_i32, %c0_i32_0 : i32, i32
  }
  func.func @transform_2(%arg0: i32) -> (i32, i32) {
    %c0_i32 = arith.constant 0 : i32
    %c0_i32_0 = arith.constant 0 : i32
    %c0_i32_1 = arith.constant 0 : i32
    return %c0_i32, %c0_i32_0 : i32, i32
  }
  func.func @transform_3(%arg0: i32) -> (i32, i32) {
    %c0_i32 = arith.constant 0 : i32
    %c0_i32_0 = arith.constant 0 : i32
    %c0_i32_1 = arith.constant 0 : i32
    return %c0_i32, %c0_i32_0 : i32, i32
  }
  func.func @transform_4(%arg0: i32) -> (i32, i32) {
    %c0_i32 = arith.constant 0 : i32
    %c0_i32_0 = arith.constant 0 : i32
    %c0_i32_1 = arith.constant 0 : i32
    return %c0_i32, %c0_i32_0 : i32, i32
  }
  func.func @transform_5(%arg0: i32) -> (i32, i32) {
    %c0_i32 = arith.constant 0 : i32
    %c0_i32_0 = arith.constant 0 : i32
    return %arg0, %c0_i32 : i32, i32
  }
}

</mosaic_0001>

<bundles_post_ra>
// kernel: tpu_custom_call.1
= control target key start
LH: loop header
LB: loop body
LE: loop exit
PB: predicated region body
PF: predicated region fallthrough
CT: control target
= control target key end

     0   :  { %10 = vsyncpa [#allocation3], 0  ;;  %s899_s0 = inlined_call_operand.vmem [shape: f32[16,32], index: 0, kind: input, shape index: {}]   ;;  %s900_s1 = inlined_call_operand.vmem [shape: f32[32,128], index: 1, kind: input, shape index: {}]   ;;  %s901_s2 = inlined_call_operand.vmem [shape: f32[1,128], index: 2, kind: input, shape index: {}]   ;;  %s902_s3 = inlined_call_operand.vmem [shape: f32[128,32], index: 3, kind: input, shape index: {}]   ;;  %s903_s4 = inlined_call_operand.vmem [shape: f32[1,32], index: 4, kind: input, shape index: {}]   ;;  %s904_s5 = inlined_call_operand.hbm [shape: f32[16,32], index: 5, kind: output, shape index: {}]  }
   0x1   :  { %12 = vsyncpa [#allocation3 + $0x1], 0  ;;  %s731_s18 = smov 0   ;;  %s733_s19 = smov 0  }
   0x2   :  { %s735_s20 = smov 0   ;;  %s737_s21 = smov 0  }
   0x3 LB: > { %s752_s22 = sadd.s32 4294967295, %s695_s21   ;;  %s478_s23 = sadd.s32 4294967294, %s695_s21   ;;  %s695_s21 = sphi %s737_s21, %s910_s21   ;;  %s691_s20 = sphi %s735_s20, %s909_s20   ;;  %s687_s19 = sphi %s733_s19, %s908_s19   ;;  %s683_s18 = sphi %s731_s18, %s907_s18  }
   0x4   : > { %s756_s24 = sadd.s32 1, %s695_s21   ;;  %s135_s25 = sadd.s32 1, %s691_s20 }
   0x5   : > { %s132_s26 = ssub.s32 %s695_s21, %s756_s24  ;;  %p145_p0 = scmp.ne.s32.totalorder %s691_s20, %s687_s19 }
   0x6   : > { %p133_p1 = scmp.eq.s32.totalorder %s132_s26, 0  ;;  %p146_p2 = scmp.eq.s32.totalorder %s752_s22, 1 }
   0x7   : > { %p151_p3 = scmp.ne.s32.totalorder %s687_s19, %s683_s18  ;;  %p152_p4 = scmp.eq.s32.totalorder %s478_s23, 1 }
   0x8   : > { %s767_s27 = scalar_select %p133_p1, %s691_s20, %s135_s25  }
   0x9   : > { %p769_p5 = por %p146_p2, %p145_p0  ;;  %p773_p6 = por %p152_p4, %p151_p3 }
   0xa   : > { %p481_p7 = scmp.ge.s32.totalorder %s695_s21, 1  ;;  %p189_p8 = scmp.lt.s32.totalorder %s695_s21, 3 }
   0xc   : > { %p190_p9 = pnand %p481_p7, %p189_p8 }
   0xd   : > { %v221_v0 = vld [vmem:[%s900_s1] sm:$0xff] (!%p190_p9)  ;;  %v222_v1 = vld [vmem:[%s900_s1 + $0x8] sm:$0xff] (!%p190_p9)  ;;  %v223_v2 = vld [vmem:[%s900_s1 + $0x10] sm:$0xff] (!%p190_p9)  ;;  %v697_v3 = vmov (!%p190_p9), 0.0|0.0   ;;  %vm698_vm0 = vmmov (!%p190_p9), 0   ;;  %v699_v6 = vmov (!%p190_p9), 0.0  }
   0xe   : > { %193 = sbr.rel (%p190_p9) target bundleno = 485 (0x1e5), region = 40  ;;  %559 = vmatprep.subr.bf16.mxu0 (!%p190_p9), %v697_v3  ;;  %v560_v4 = vpack.c.bf16 (!%p190_p9), %v222_v1, %v221_v0  ;;  %v224_v5 = vld [vmem:[%s900_s1 + $0x18] sm:$0xff] (!%p190_p9)  ;;  %521 = vmatprep.mubr.msk.f32.mxu0 (!%p190_p9), %vm698_vm0, %v699_v6  ;;  %p216_p10 = scmp.lt.s32.totalorder (!%p190_p9), %s752_s22, 1  ;;  %v311_v7 = vld [vmem:[%s902_s3] sm:$0xff] (!%p190_p9)  ;;  %v312_v8 = vld [vmem:[%s902_s3 + $0x8] sm:$0xff] (!%p190_p9)  ;;  %vm232_vm1 = vcmask (!%p190_p9), 261120  }
   0xf   : > { %565 = vmatprep.subr.bf16.mxu1 (!%p190_p9), %v697_v3  ;;  %v566_v9 = vpack.c.bf16 (!%p190_p9), %v312_v8, %v311_v7  ;;  %v313_v10 = vld [vmem:[%s902_s3 + $0x10] sm:$0xff] (!%p190_p9)  ;;  %v314_v11 = vld [vmem:[%s902_s3 + $0x18] sm:$0xff] (!%p190_p9)  ;;  %556 = vmatprep.mubr.msk.f32.mxu1 (!%p190_p9), %vm698_vm0, %v699_v6  ;;  %v563_v12 = vpack.c.bf16 (!%p190_p9), %v224_v5, %v223_v2  ;;  %v315_v14 = vld [vmem:[%s902_s3 + $0x20] sm:$0xff] (!%p190_p9)  ;;  %s213_s26 = sand.u32 (!%p190_p9), 1, %s687_s19   ;;  %s488_s8 = sshll.u32 (!%p190_p9), %s752_s22, 7 }
  0x10   : > { %561 = vmatpush3.bf16.msra.mxu0 (!%p190_p9), %v560_v4  ;;  %v569_v13 = vpack.c.bf16 (!%p190_p9), %v314_v11, %v313_v10  ;;  %v316_v15 = vld [vmem:[%s902_s3 + $0x28] sm:$0xff] (!%p190_p9)  ;;  %v317_v18 = vld [vmem:[%s902_s3 + $0x30] sm:$0xff] (!%p190_p9)  ;;  %v318_v19 = vld [vmem:[%s902_s3 + $0x38] sm:$0xff] (!%p190_p9)  ;;  %s406_s14 = scalar_lea.sflag (!%p190_p9), [#allocation3], %s213_s26 }
  0x11   : > { %562 = vmatprep.subr.bf16.mxu0 (!%p190_p9), %v697_v3  ;;  %567 = vmatpush3.bf16.msra.mxu1 (!%p190_p9), %v566_v9  ;;  %v572_v17 = vpack.c.bf16 (!%p190_p9), %v316_v15, %v315_v14  ;;  %v575_v20 = vpack.c.bf16 (!%p190_p9), %v318_v19, %v317_v18  ;;  %v319_v21 = vld [vmem:[%s902_s3 + $0x40] sm:$0xff] (!%p190_p9)  ;;  %v320_v22 = vld [vmem:[%s902_s3 + $0x48] sm:$0xff] (!%p190_p9)  ;;  %v321_v24 = vld [vmem:[%s902_s3 + $0x50] sm:$0xff] (!%p190_p9) }
  0x12   : > { %568 = vmatprep.subr.bf16.mxu1 (!%p190_p9), %v697_v3  ;;  %v578_v23 = vpack.c.bf16 (!%p190_p9), %v320_v22, %v319_v21  ;;  %v322_v25 = vld [vmem:[%s902_s3 + $0x58] sm:$0xff] (!%p190_p9)  ;;  %v323_v27 = vld [vmem:[%s902_s3 + $0x60] sm:$0xff] (!%p190_p9)  ;;  %v324_v28 = vld [vmem:[%s902_s3 + $0x68] sm:$0xff] (!%p190_p9) }
  0x13   : > { %v581_v26 = vpack.c.bf16 (!%p190_p9), %v322_v25, %v321_v24  ;;  %v584_v29 = vpack.c.bf16 (!%p190_p9), %v324_v28, %v323_v27  ;;  %v325_v30 = vld [vmem:[%s902_s3 + $0x70] sm:$0xff] (!%p190_p9)  ;;  %v326_v31 = vld [vmem:[%s902_s3 + $0x78] sm:$0xff] (!%p190_p9)  ;;  %v484_v33 = vld [vmem:[%s901_s2] ss:$0 sm:$0xff] (!%p190_p9) }
  0x14   : > { %564 = vmatpush3.bf16.msra.mxu0 (!%p190_p9), %v563_v12  ;;  %v587_v32 = vpack.c.bf16 (!%p190_p9), %v326_v31, %v325_v30  ;;  %v486_v42 = vld [vmem:[%s903_s4] ss:$0 sm:$0xff] (!%p190_p9) }
  0x15   : > { %s217_s30 = scalar_select %p216_p10, %s752_s22, 1  ;;  %570 = vmatpush3.bf16.msra.mxu1 %v569_v13 }
  0x16   : > { %571 = vmatprep.subr.bf16.mxu1 %v697_v3  ;;  %s700_s22 = smov [#allocation2]  }
  0x17   : > { %s483_s6 = sshll.u32 %s217_s30, 3  ;;  %s482_s30 = sshll.u32 %s213_s26, 3 }
  0x18   : > { %s219_s13 = scalar_lea.vmem %s899_s0, %s483_s6  ;;  %s215_s9 = scalar_lea.vmem [#allocation2], %s482_s30 }
  0x19   : > { %v220_v16 = vld [vmem:[%s219_s13] sm:$0xff]  ;;  %573 = vmatpush3.bf16.msra.mxu1 %v572_v17  ;;  %s419_s10 = sshll.u32 %s215_s9, 4  ;;  %s856_s13 = scalar_lea.hbm %s904_s5, %s488_s8  ;;  %s858_s10 = int_to_ptr.vmem [resolvable:$true] %s419_s10 }
  0x1a   : > { %522 = vmatmul.mubr.msk.f32.vlgmr.msra.gmra.mrb[0].mxu0 %vm232_vm1, %v220_v16  ;;  %574 = vmatprep.subr.bf16.mxu1 %v697_v3  ;;  %s633_s15 = scalar_lea.vmem %s858_s10, 128  ;;  %s637_s16 = sshll.u32 %s700_s22, 4  ;;  %s638_s16 = int_to_ptr.vmem [resolvable:$false] %s637_s16 }
  0x1b   : > { %p634_p11 = scmp.ne.s32.totalorder %s858_s10, %s633_s15  ;;  %s639_s17 = scalar_lea.vmem %s638_s16, 256 }
  0x1c   : > { %p640_p0 = scmp.lt.s32.totalorder %s858_s10, %s638_s16  ;;  %p641_p1 = scmp.lt.s32.totalorder %s639_s17, %s633_s15 }
  0x1d   : > { %576 = vmatpush3.bf16.msra.mxu1 %v575_v20  ;;  %p635_p12 = pnand %p634_p11, %p769_p5 }
  0x1e   : > { %577 = vmatprep.subr.bf16.mxu1 %v697_v3  ;;  %p642_p2 = por %p641_p1, %p640_p0 }
  0x1f   : > { %p636_p13 = pneg %p635_p12 }
  0x21   : > { %579 = vmatpush3.bf16.msra.mxu1 %v578_v23  ;;  %p643_p3 = pnand %p642_p2, %p636_p13 }
  0x22   : > { %580 = vmatprep.subr.bf16.mxu1 %v697_v3 }
  0x25   : > { %582 = vmatpush3.bf16.msra.mxu1 %v581_v26 }
  0x26   : > { %583 = vmatprep.subr.bf16.mxu1 %v697_v3 }
  0x29   : > { %585 = vmatpush3.bf16.msra.mxu1 %v584_v29 }
  0x2a   : > { %586 = vmatprep.subr.bf16.mxu1 %v697_v3 }
  0x2d   : > { %588 = vmatpush3.bf16.msra.mxu1 %v587_v32 }
  0xed   : > { %v302_v34 = vpop.f32.mrb[0].mxu0 }
  0xee   : > { %v303_v35 = vadd.f32 %v484_v33, %v302_v34  ;;  %v523_v36 = vpop.f32.mrb[1].mxu0 }
  0xf0   : > { %v307_v37 = vmul.f32 0.70710677, %v303_v35  ;;  %v306_v39 = vmul.f32 0.5, %v303_v35 }
  0xf2   : > { %631 = verf.f32 %v307_v37 }
  0xfc   : > { %v632_v38 = vpop.eup %631 }
  0xfd   : > { %v309_v40 = vadd.f32 1.0, %v632_v38 }
  0xff   : > { %v310_v41 = vmul.f32 %v309_v40, %v306_v39 }
 0x101   : > { %557 = vmatmul.mubr.f32.vlgmr.msra.gmra.mrb[0].mxu1 %v310_v41 }
 0x1d4   : > { %v400_v43 = vpop.f32.mrb[0].mxu1 }
 0x1d5   : > { %v401_v44 = vadd.f32 %v486_v42, %v400_v43  ;;  %v558_v45 = vpop.f32.mrb[1].mxu1 }
 0x1d7   : > { %404 = vst.msk [vmem:[%s215_s9] sm:$0xff] %vm232_vm1, %v401_v44 }
 0x1d8   : > { %646 = shalt.err (!%p643_p3)
}
 0x1d9   : > { %s647_s23 = scalar_lea.hbm %s856_s13, 128  ;;  %s651_s30 = scalar_lea.hbm %s904_s5, 256 }
 0x1da   : > { %p648_p4 = scmp.ne.s32.totalorder %s856_s13, %s647_s23  ;;  %p652_p9 = scmp.lt.u32.totalorder %s856_s13, %s904_s5 }
 0x1db   : > { %p653_p10 = scmp.lt.u32.totalorder %s651_s30, %s647_s23  ;;  %p655_p12 = scmp.lt.u32.totalorder %s647_s23, %s856_s13 }
 0x1dc   : > { %p649_p7 = pnand %p648_p4, %p769_p5 }
 0x1dd   : > { %p654_p11 = por %p653_p10, %p652_p9 }
 0x1de   : > { %p650_p8 = pneg %p649_p7 }
 0x1df   : > { %p656_p13 = por %p655_p12, %p654_p11 }
 0x1e1   : > { %p657_p0 = pnand %p656_p13, %p650_p8 }
 0x1e3   : > { %660 = shalt.err (!%p657_p0)
}
 0x1e4   : > { %589 = dma.vmem_to_hbm [thread:$0]  (%p769_p5), %s858_s10, 128, %s856_s13, %s406_s14  }
 0x1e5 PF: > { %p595_p1 = scmp.ge.s32.totalorder %s695_s21, 2  ;;  %s431_s8 = sand.u32 1, %s683_s18  }
 0x1e6   : > { %s432_s9 = scalar_lea.sflag [#allocation3], %s431_s8 }
 0x1e7   : > { %p592_p2 = pnand %p595_p1, %p773_p6 }
 0x1e9   : > { %678 = dma.done.wait (!%p592_p2), %s432_s9, 128  }
 0x1ea   : > { %680 = vsyncadd (!%p592_p2), %s432_s9, 4294967168  ;;  %p15_p3 = scmp.ge.s32.totalorder %s756_s24, 4   ;;  %s907_s18 = smov %s687_s19 }
 0x1eb   : > { %s908_s19 = smov %s691_s20  ;;  %s909_s20 = smov %s767_s27 }
 0x1ec   : > { %s910_s21 = smov %s756_s24  ;;  %17 = sbr.rel (!%p15_p3) target bundleno = 3 (0x3), region = 75 }
 0x1f3   :  { %437 = vsyncpa [#allocation3], 1 }
 0x1f4   :  { %439 = vsyncpa [#allocation3 + $0x1], 1 }

</bundles_post_ra>
